<compile_context>
chip_gen: v5e
topology: v5e:2x2
jax: 0.10.0
libtpu: 0.0.40
codegen_flags: <defaults>
</compile_context>

<pallas_src>
from functools import partial

import jax
import jax.numpy as jnp
from jax.experimental import pallas as pl
from jax.experimental.pallas import tpu as pltpu


# --------------------------------------------------------------------------
# Kernel
# --------------------------------------------------------------------------
def _ffn_kernel(x_ref, w13_ref, w2_ref, o_ref, acc_ref, *, th):
    """One (row-tile, hidden-tile) step of the SwiGLU FFN.

    x_ref   : (tm, D)      bf16  row tile of the input
    w13_ref : (D, 2*th)    bf16  hidden-tile slice of [w1 | w3] (pre-transposed)
    w2_ref  : (th, D)      bf16  hidden-tile slice of w2 (pre-transposed)
    o_ref   : (tm, D)      bf16  output row tile
    acc_ref : (tm, D)      f32   VMEM accumulator, resident across hidden tiles
    """
    j = pl.program_id(1)

    @pl.when(j == 0)
    def _init():
        acc_ref[...] = jnp.zeros_like(acc_ref)

    x = x_ref[...]                                                    # (tm, D) bf16

    # Fused gate/up projection: one wide MXU contraction, f32 accumulation.
    ab = jnp.dot(x, w13_ref[...], preferred_element_type=jnp.float32)  # (tm, 2*th)
    a = ab[:, :th]                                                     # w1(x)
    b = ab[:, th:]                                                     # w3(x)

    # SwiGLU gate in f32 (sigmoid runs on the EUP slot).
    g = (a * jax.nn.sigmoid(a)) * b                                    # (tm, th)

    # Down projection, accumulated over hidden tiles in f32.
    acc_ref[...] += jnp.dot(g.astype(w2_ref.dtype), w2_ref[...],
                            preferred_element_type=jnp.float32)

    @pl.when(j == pl.num_programs(1) - 1)
    def _finalize():
        o_ref[...] = acc_ref[...].astype(o_ref.dtype)


# --------------------------------------------------------------------------
# Tile selection / helpers
# --------------------------------------------------------------------------
def _round_up(n, m):
    return ((n + m - 1) // m) * m


def _vmem_capacity_bytes():
    try:
        return int(pltpu.get_tpu_info().vmem_capacity_bytes)
    except Exception:
        return 64 * 1024 * 1024  # conservative (v7x per-TC)


def _hidden_tile(H, cap):
    """Largest lane-aligned (multiple-of-128) divisor of H that is <= cap,
    or H itself if H <= cap or no aligned divisor exists."""
    if H <= cap:
        return H
    t = (cap // 128) * 128
    while t >= 128:
        if H % t == 0:
            return t
        t -= 128
    return H


def _step_vmem_bytes(tm, th, D):
    """Per-step VMEM footprint: double-buffered bf16 streams + f32 accumulator."""
    x_b = 2 * tm * D * 2
    w13_b = 2 * D * (2 * th) * 2
    w2_b = 2 * th * D * 2
    out_b = 2 * tm * D * 2
    acc_b = tm * D * 4
    return x_b + w13_b + w2_b + out_b + acc_b


def _pick_tiles(M, H, D, vmem_cap):
    budget = int(vmem_cap * 0.7)
    # Candidates, largest first. v6e/v5e (128 MiB) land on (1024, 512);
    # v7x (64 MiB) lands on (512, 256) for Llama-class D/H.
    candidates = ((1024, 512), (768, 512), (512, 512), (512, 256),
                  (384, 256), (256, 512), (256, 256), (128, 256), (128, 128))
    tm_target, th = candidates[-1][0], _hidden_tile(H, candidates[-1][1])
    for tm_c, th_c in candidates:
        th_try = _hidden_tile(H, th_c)
        if _step_vmem_bytes(tm_c, th_try, D) <= budget:
            tm_target, th = tm_c, th_try
            break

    # Row tile: keep >= 2 row tiles for small M (feeds both v7x TensorCores),
    # sublane-aligned (multiple of 8); M is padded up to a tile multiple.
    if M <= 8:
        tm = 8
    elif M <= tm_target:
        tm = _round_up(pl.cdiv(M, 2), 8)
    else:
        tm = tm_target
    return tm, th


# --------------------------------------------------------------------------
# Weight preparation (do ONCE at parameter load time, not per call)
# --------------------------------------------------------------------------
def prepare_ffn_weights(w1, w2, w3):
    """Torch-layout weights -> kernel operands.

    w1 : (H, D)   w2 : (D, H)   w3 : (H, D)
    Returns (w13, w2_t): w13 = [w1^T | w3^T] (D, 2H) bf16, w2_t = w2^T (H, D) bf16.
    """
    w13 = jnp.concatenate([jnp.transpose(w1), jnp.transpose(w3)], axis=1)
    return w13.astype(jnp.bfloat16), jnp.transpose(w2).astype(jnp.bfloat16)


# --------------------------------------------------------------------------
# Forward
# --------------------------------------------------------------------------
def feed_forward_forward(x, w13, w2_t, *, tm=None, th=None):
    """SwiGLU FFN forward.

    x    : (B, S, D)  any float dtype (cast to bf16 for the MXU)
    w13  : (D, 2H)    bf16, pre-fused [w1^T | w3^T]   (see prepare_ffn_weights)
    w2_t : (H, D)     bf16, pre-transposed w2
    Returns (B, S, D) bf16.
    """
    B, S, D = x.shape
    H = w2_t.shape[0]
    M = B * S

    vmem_cap = _vmem_capacity_bytes()
    auto_tm, auto_th = _pick_tiles(M, H, D, vmem_cap)
    tm = auto_tm if tm is None else tm
    th = auto_th if th is None else th
    assert H % th == 0, "hidden tile must divide H"

    # Pad rows to a tile multiple (no divisibility requirement on B*S).
    Mp = _round_up(M, tm)
    xb = x.reshape(M, D).astype(jnp.bfloat16)
    if Mp != M:
        xb = jnp.pad(xb, ((0, Mp - M), (0, 0)))

    grid = (Mp // tm, H // th)

    need = _step_vmem_bytes(tm, th, D)
    vmem_limit = min(need + (8 << 20), int(vmem_cap * 0.9))
    vmem_limit = max(vmem_limit, 32 << 20)

    out = pl.pallas_call(
        partial(_ffn_kernel, th=th),
        out_shape=jax.ShapeDtypeStruct((Mp, D), jnp.bfloat16),
        grid_spec=pltpu.PrefetchScalarGridSpec(
            num_scalar_prefetch=0,
            grid=grid,
            in_specs=[
                pl.BlockSpec((tm, D), lambda i, j: (i, 0)),        # x rows
                pl.BlockSpec((D, 2 * th), lambda i, j: (0, j)),    # [w1|w3] tile
                pl.BlockSpec((th, D), lambda i, j: (j, 0)),        # w2 tile
            ],
            out_specs=pl.BlockSpec((tm, D), lambda i, j: (i, 0)),
            scratch_shapes=[pltpu.VMEM((tm, D), jnp.float32)],
        ),
        compiler_params=pltpu.CompilerParams(
            # rows are independent (megacore / v7x 2-TC sharding);
            # the hidden axis is the reduction -> arbitrary.
            dimension_semantics=("parallel", "arbitrary"),
            vmem_limit_bytes=int(vmem_limit),
        ),
    )(xb, w13, w2_t)

    return out[:M].reshape(B, S, D)


# --------------------------------------------------------------------------
# Pure-JAX reference (same bf16 operand rounding, f32 accumulation)
# --------------------------------------------------------------------------
def feed_forward_reference(x, w13, w2_t):
    B, S, D = x.shape
    H = w2_t.shape[0]
    xb = x.reshape(B * S, D).astype(jnp.bfloat16)
    ab = jnp.dot(xb, w13, preferred_element_type=jnp.float32)
    a, b = ab[:, :H], ab[:, H:]
    g = (a * jax.nn.sigmoid(a)) * b
    out = jnp.dot(g.astype(jnp.bfloat16), w2_t, preferred_element_type=jnp.float32)
    return out.reshape(B, S, D).astype(jnp.bfloat16)


def _llama_hidden_dim(hidden_dim, multiple_of, ffn_dim_multiplier):
    """Same hidden-dim derivation as the PyTorch __init__."""
    hidden_dim = int(2 * hidden_dim / 3)
    if ffn_dim_multiplier is not None:
        hidden_dim = int(ffn_dim_multiplier * hidden_dim)
    hidden_dim = multiple_of * ((hidden_dim + multiple_of - 1) // multiple_of)
    return hidden_dim


if __name__ == "__main__":
    # Small shapes consistent with the module:
    #   dim=64, hidden_dim(arg)=4*dim, multiple_of=128, ffn_dim_multiplier=None
    #   -> effective hidden dim H = 256
    B, S, DIM = 2, 8, 64
    H = _llama_hidden_dim(hidden_dim=4 * DIM, multiple_of=128,
                          ffn_dim_multiplier=None)   # = 256

    key = jax.random.PRNGKey(0)
    kx, k1, k2, k3 = jax.random.split(key, 4)
    x = jax.random.normal(kx, (B, S, DIM), jnp.float32)
    # Torch-layout weights: w1/w3 are (H, D), w2 is (D, H).
    w1 = 0.05 * jax.random.normal(k1, (H, DIM), jnp.float32)
    w3 = 0.05 * jax.random.normal(k3, (H, DIM), jnp.float32)
    w2 = 0.05 * jax.random.normal(k2, (DIM, H), jnp.float32)

    # One-time weight preparation (transpose + fuse + bf16 cast).
    w13, w2_t = prepare_ffn_weights(w1, w2, w3)

    out = feed_forward_forward(x, w13, w2_t)
    out = jax.block_until_ready(out)

    ref = feed_forward_reference(x, w13, w2_t)
    assert out.shape == (B, S, DIM)
    assert out.dtype == jnp.bfloat16
    assert jnp.allclose(out.astype(jnp.float32), ref.astype(jnp.float32),
                        atol=2e-2, rtol=2e-2), "mismatch vs reference"
    print("KERNEL_OK")
</pallas_src>

<mosaic_0001>
module attributes {stable_mosaic.version = 11 : i64} {
  func.func @_ffn_kernel(%arg0: i32, %arg1: i32, %arg2: memref<8x64xbf16, #tpu.memory_space<vmem>>, %arg3: memref<64x512xbf16, #tpu.memory_space<vmem>>, %arg4: memref<256x64xbf16, #tpu.memory_space<vmem>>, %arg5: memref<8x64xbf16, #tpu.memory_space<vmem>>, %arg6: memref<8x64xf32, #tpu.memory_space<vmem>>) attributes {dimension_semantics = [#tpu.dimension_semantics<parallel>, #tpu.dimension_semantics<arbitrary>], iteration_bounds = array<i64: 2, 1>, scalar_prefetch = 0 : i64, scratch_operands = 1 : i64, tpu.core_type = #tpu.core_type<tc>, window_params = [{transform_indices = @transform_0, window_bounds = array<i64: 8, 64>}, {transform_indices = @transform_1, window_bounds = array<i64: 64, 512>}, {transform_indices = @transform_2, window_bounds = array<i64: 256, 64>}, {transform_indices = @transform_3, window_bounds = array<i64: 8, 64>}]} {
    %c0_i32 = arith.constant 0 : i32
    %0 = arith.cmpi eq, %arg1, %c0_i32 : i32
    %1 = arith.extui %0 : i1 to i32
    %c0_i32_0 = arith.constant 0 : i32
    %2 = arith.cmpi ne, %1, %c0_i32_0 : i32
    scf.if %2 {
      %cst_14 = arith.constant 0.000000e+00 : f32
      %24 = vector.broadcast %cst_14 : f32 to vector<8x64xf32>
      %c0_15 = arith.constant 0 : index
      %c0_16 = arith.constant 0 : index
      %25 = vector.load %arg6[%c0_15, %c0_16] : memref<8x64xf32, #tpu.memory_space<vmem>>, vector<8x64xf32>
      tpu.vector_store %arg6[%c0_15, %c0_16], %24 {strides = array<i32>} : memref<8x64xf32, #tpu.memory_space<vmem>>, vector<8x64xf32>,
    } else {
    }
    %c0 = arith.constant 0 : index
    %c0_1 = arith.constant 0 : index
    %3 = vector.load %arg2[%c0, %c0_1] : memref<8x64xbf16, #tpu.memory_space<vmem>>, vector<8x64xbf16>
    %c0_2 = arith.constant 0 : index
    %c0_3 = arith.constant 0 : index
    %4 = vector.load %arg3[%c0_2, %c0_3] : memref<64x512xbf16, #tpu.memory_space<vmem>>, vector<64x512xbf16>
    %cst = arith.constant dense<0.000000e+00> : vector<8x512xf32>
    %5 = tpu.matmul %3, %4, %cst {dimension_numbers = #tpu.dot_dimension_numbers<[1], [0], [0], [1], [0, 0, 1, 1], [], []>} : vector<8x64xbf16>, vector<64x512xbf16>, vector<8x512xf32> -> vector<8x512xf32>
    %6 = vector.extract_strided_slice %5 {offsets = [0, 0], sizes = [8, 256], strides = [1, 1]} : vector<8x512xf32> to vector<8x256xf32>
    %7 = vector.extract_strided_slice %5 {offsets = [0, 256], sizes = [8, 256], strides = [1, 1]} : vector<8x512xf32> to vector<8x256xf32>
    %8 = arith.negf %6 : vector<8x256xf32>
    %9 = math.exp %8 : vector<8x256xf32>
    %cst_4 = arith.constant 1.000000e+00 : f32
    %10 = vector.broadcast %cst_4 : f32 to vector<8x256xf32>
    %11 = arith.addf %10, %9 : vector<8x256xf32>
    %12 = arith.divf %10, %11 : vector<8x256xf32>
    %13 = arith.mulf %6, %12 : vector<8x256xf32>
    %14 = arith.mulf %13, %7 : vector<8x256xf32>
    %c0_5 = arith.constant 0 : index
    %c0_6 = arith.constant 0 : index
    %15 = vector.load %arg6[%c0_5, %c0_6] : memref<8x64xf32, #tpu.memory_space<vmem>>, vector<8x64xf32>
    %16 = arith.truncf %14 : vector<8x256xf32> to vector<8x256xbf16>
    %c0_7 = arith.constant 0 : index
    %c0_8 = arith.constant 0 : index
    %17 = vector.load %arg4[%c0_7, %c0_8] : memref<256x64xbf16, #tpu.memory_space<vmem>>, vector<256x64xbf16>
    %cst_9 = arith.constant dense<0.000000e+00> : vector<8x64xf32>
    %18 = tpu.matmul %16, %17, %cst_9 {dimension_numbers = #tpu.dot_dimension_numbers<[1], [0], [0], [1], [0, 0, 1, 1], [], []>} : vector<8x256xbf16>, vector<256x64xbf16>, vector<8x64xf32> -> vector<8x64xf32>
    %19 = arith.addf %15, %18 : vector<8x64xf32>
    %c0_10 = arith.constant 0 : index
    %c0_11 = arith.constant 0 : index
    %20 = vector.load %arg6[%c0_10, %c0_11] : memref<8x64xf32, #tpu.memory_space<vmem>>, vector<8x64xf32>
    tpu.vector_store %arg6[%c0_10, %c0_11], %19 {strides = array<i32>} : memref<8x64xf32, #tpu.memory_space<vmem>>, vector<8x64xf32>,
    %c0_i32_12 = arith.constant 0 : i32
    %21 = arith.cmpi eq, %arg1, %c0_i32_12 : i32
    %22 = arith.extui %21 : i1 to i32
    %c0_i32_13 = arith.constant 0 : i32
    %23 = arith.cmpi ne, %22, %c0_i32_13 : i32
    scf.if %23 {
      %c0_14 = arith.constant 0 : index
      %c0_15 = arith.constant 0 : index
      %24 = vector.load %arg6[%c0_14, %c0_15] : memref<8x64xf32, #tpu.memory_space<vmem>>, vector<8x64xf32>
      %25 = arith.truncf %24 : vector<8x64xf32> to vector<8x64xbf16>
      %c0_16 = arith.constant 0 : index
      %c0_17 = arith.constant 0 : index
      %26 = vector.load %arg5[%c0_16, %c0_17] : memref<8x64xbf16, #tpu.memory_space<vmem>>, vector<8x64xbf16>
      tpu.vector_store %arg5[%c0_16, %c0_17], %25 {strides = array<i32>} : memref<8x64xbf16, #tpu.memory_space<vmem>>, vector<8x64xbf16>,
    } else {
    }
    return
  }
  func.func @transform_0(%arg0: i32, %arg1: i32) -> (i32, i32) {
    %c0_i32 = arith.constant 0 : i32
    %c0_i32_0 = arith.constant 0 : i32
    return %arg0, %c0_i32 : i32, i32
  }
  func.func @transform_1(%arg0: i32, %arg1: i32) -> (i32, i32) {
    %c0_i32 = arith.constant 0 : i32
    %c0_i32_0 = arith.constant 0 : i32
    return %c0_i32, %arg1 : i32, i32
  }
  func.func @transform_2(%arg0: i32, %arg1: i32) -> (i32, i32) {
    %c0_i32 = arith.constant 0 : i32
    %c0_i32_0 = arith.constant 0 : i32
    return %arg1, %c0_i32 : i32, i32
  }
  func.func @transform_3(%arg0: i32, %arg1: i32) -> (i32, i32) {
    %c0_i32 = arith.constant 0 : i32
    %c0_i32_0 = arith.constant 0 : i32
    return %arg0, %c0_i32 : i32, i32
  }
}

</mosaic_0001>

<bundles_post_ra>
// kernel: tpu_custom_call.1
= control target key start
LH: loop header
LB: loop body
LE: loop exit
PB: predicated region body
PF: predicated region fallthrough
CT: control target
= control target key end

     0   :  { %8 = vsyncpa [#allocation4], 0  ;;  %s1294_s0 = inlined_call_operand.vmem [shape: bf16[16,64], index: 0, kind: input, shape index: {}]   ;;  %s1295_s1 = inlined_call_operand.vmem [shape: bf16[64,512], index: 1, kind: input, shape index: {}]   ;;  %s1296_s2 = inlined_call_operand.vmem [shape: bf16[256,64], index: 2, kind: input, shape index: {}]   ;;  %s1297_s3 = inlined_call_operand.hbm [shape: bf16[16,64], index: 3, kind: output, shape index: {}]  }
   0x1   :  { %10 = vsyncpa [#allocation4 + $0x1], 0  ;;  %s1047_s12 = smov 0   ;;  %s1049_s13 = smov 0  }
   0x2   :  { %s1051_s14 = smov 0   ;;  %s1053_s15 = smov 0  }
   0x3   :  { %s1055_s16 = smov 0   ;;  %s1057_s17 = smov 0  }
   0x4 LB: > { %s703_s18 = sadd.s32 4294967295, %s1024_s17   ;;  %s704_s19 = sadd.s32 4294967294, %s1024_s17   ;;  %s1024_s17 = sphi %s1057_s17, %s16_s17   ;;  %s1020_s16 = sphi %s1055_s16, %s1304_s16   ;;  %s1016_s15 = sphi %s1053_s15, %s1303_s15   ;;  %s1012_s14 = sphi %s1051_s14, %s1302_s14   ;;  %s1008_s13 = sphi %s1049_s13, %s1301_s13   ;;  %s1004_s12 = sphi %s1047_s12, %s1300_s12  }
   0x5   : > { %s28_s20 = sadd.s32 1, %s1020_s16  ;;  %s113_s21 = sadd.s32 1, %s1012_s14 }
   0x6   : > { %p30_p0 = scmp.ge.s32.totalorder %s28_s20, 2  ;;  %p123_p1 = scmp.ne.s32.totalorder %s1012_s14, %s1008_s13 }
   0x7   : > { %p124_p2 = scmp.eq.s32.totalorder %s703_s18, 1  ;;  %p129_p3 = scmp.ne.s32.totalorder %s1008_s13, %s1004_s12 }
   0x8   : > { %s1306_s20 = smov (%p30_p0, %s28_s20), 0  ;;  %p130_p5 = scmp.eq.s32.totalorder %s704_s19, 1 }
   0x9   : > { %p1087_p4 = por %p124_p2, %p123_p1  ;;  %s110_s23 = ssub.s32 %s1020_s16, %s1306_s20 }
   0xa   : > { %p709_p6 = scmp.ge.s32.totalorder %s1024_s17, 1  ;;  %p111_p7 = scmp.eq.s32.totalorder %s110_s23, 0 }
   0xb   : > { %p1094_p8 = por %p130_p5, %p129_p3  ;;  %p173_p9 = scmp.lt.s32.totalorder %s1024_s17, 3 }
   0xc   : > { %s1100_s25 = scalar_select %p111_p7, %s1012_s14, %s113_s21  }
   0xd   : > { %p174_p10 = pnand %p709_p6, %p173_p9 }
   0xe   : > { %p206_p11 = scmp.lt.s32.totalorder (!%p174_p10), %s1016_s15, 1  ;;  %s203_s26 = sand.u32 (!%p174_p10), 1, %s1008_s13  }
   0xf   : > { %177 = sbr.rel (%p174_p10) target bundleno = 348 (0x15c), region = 32  ;;  %s710_s27 = sshll.u32 (!%p174_p10), %s203_s26, 2 }
  0x10   : > { %s847_s28 = sshll.u32 (!%p174_p10), %s1016_s15, 2  ;;  %s205_s4 = scalar_lea.vmem (!%p174_p10), [#allocation3], %s710_s27 }
  0x11   : > { %s601_s30 = scalar_lea.hbm (!%p174_p10), %s1297_s3, %s847_s28  ;;  %s603_s5 = sshll.u32 (!%p174_p10), %s205_s4, 4  ;;  %s604_s5 = int_to_ptr.vmem [resolvable:$true] %s603_s5 }
  0x12   : > { %s605_s6 = sshll.u32 (!%p174_p10), %s601_s30, 4  ;;  %s591_s7 = scalar_lea.sflag (!%p174_p10), [#allocation4], %s203_s26  ;;  %s606_s6 = int_to_ptr.hbm [resolvable:$true] %s605_s6 }
  0x13   : > { %s966_s11 = scalar_lea.hbm (!%p174_p10), %s1297_s3, 8 }
  0x14   : > { %v762_v0 = vld [vmem:[%s1295_s1 + $0x60] sm:$0xf]  ;;  %v864_v1 = vld [vmem:[%s1295_s1 + $0x6c] sm:$0xf0]  ;;  %v862_v2 = vld [vmem:[%s1295_s1 + $0x64] sm:$0xf] }
  0x15   : > { %v763_v3 = vor.u32 %v864_v1, %v762_v0  ;;  %v764_v4 = vld [vmem:[%s1295_s1 + $0x70] sm:$0xf0]  ;;  %v746_v5 = vld [vmem:[%s1295_s1 + $0x40] sm:$0xf]  ;;  %v860_v6 = vld [vmem:[%s1295_s1 + $0x4c] sm:$0xf0] }
  0x16   : > { %v767_v7 = vor.u32 %v862_v2, %v764_v4  ;;  %v858_v8 = vld [vmem:[%s1295_s1 + $0x44] sm:$0xf]  ;;  %v748_v9 = vld [vmem:[%s1295_s1 + $0x50] sm:$0xf0]  ;;  %v747_v10 = vor.u32 %v860_v6, %v746_v5  ;;  %v730_v12 = vld [vmem:[%s1295_s1 + $0x20] sm:$0xf] }
  0x17   : > { %334 = vmatpush.bf16.msra.mxu2 %v763_v3  ;;  %v751_v11 = vor.u32 %v858_v8, %v748_v9  ;;  %v856_v13 = vld [vmem:[%s1295_s1 + $0x2c] sm:$0xf0]  ;;  %v854_v14 = vld [vmem:[%s1295_s1 + $0x24] sm:$0xf]  ;;  %v732_v15 = vld [vmem:[%s1295_s1 + $0x30] sm:$0xf0] }
  0x18   : > { %347 = vmatpush.bf16.msra.mxu3 %v767_v7  ;;  %v731_v16 = vor.u32 %v856_v13, %v730_v12  ;;  %v714_v17 = vld [vmem:[%s1295_s1] sm:$0xf]  ;;  %s207_s8 = scalar_select %p206_p11, %s1016_s15, 1  ;;  %v735_v18 = vor.u32 %v854_v14, %v732_v15  ;;  %v852_v19 = vld [vmem:[%s1295_s1 + $0xc] sm:$0xf0]  ;;  %vm227_vm0 = vcmask 523264  }
  0x19   : > { %v850_v20 = vld [vmem:[%s1295_s1 + $0x4] sm:$0xf]  ;;  %v716_v21 = vld [vmem:[%s1295_s1 + $0x10] sm:$0xf0]  ;;  %v770_v22 = vld [vmem:[%s1295_s1 + $0x68] sm:$0xf]  ;;  %v715_v26 = vor.u32 %v852_v19, %v714_v17 }
  0x1a   : > { %s711_s23 = sshll.u32 %s207_s8, 2  ;;  %v865_v23 = vld [vmem:[%s1295_s1 + $0x74] sm:$0xf0]  ;;  %v863_v24 = vld [vmem:[%s1295_s1 + $0x6c] sm:$0xf]  ;;  %v719_v27 = vor.u32 %v850_v20, %v716_v21  ;;  %v872_v51 = vld [vmem:[%s1296_s2 + $0x30] sm:$0xff] }
  0x1b   : > { %335 = vmatpush.bf16.msra.mxu2 %v747_v10  ;;  %v772_v25 = vld [vmem:[%s1295_s1 + $0x78] sm:$0xf0]  ;;  %s209_s9 = scalar_lea.vmem %s1294_s0, %s711_s23  ;;  %v771_v28 = vor.u32 %v865_v23, %v770_v22  ;;  %v754_v30 = vld [vmem:[%s1295_s1 + $0x48] sm:$0xf]  ;;  %v861_v31 = vld [vmem:[%s1295_s1 + $0x54] sm:$0xf0] }
  0x1c   : > { %348 = vmatpush.bf16.msra.mxu3 %v751_v11  ;;  %v775_v29 = vor.u32 %v863_v24, %v772_v25  ;;  %v859_v32 = vld [vmem:[%s1295_s1 + $0x4c] sm:$0xf]  ;;  %v756_v33 = vld [vmem:[%s1295_s1 + $0x58] sm:$0xf0]  ;;  %v229_v34 = vld [vmem:[%s209_s9] sm:$0xf]  ;;  %v755_v35 = vor.u32 %v861_v31, %v754_v30 }
  0x1d   : > { %v759_v36 = vor.u32 %v859_v32, %v756_v33  ;;  %v738_v37 = vld [vmem:[%s1295_s1 + $0x28] sm:$0xf]  ;;  %v857_v38 = vld [vmem:[%s1295_s1 + $0x34] sm:$0xf0]  ;;  %v855_v39 = vld [vmem:[%s1295_s1 + $0x2c] sm:$0xf] }
  0x1e   : > { %v740_v40 = vld [vmem:[%s1295_s1 + $0x38] sm:$0xf0]  ;;  %v739_v41 = vor.u32 %v857_v38, %v738_v37  ;;  %v722_v43 = vld [vmem:[%s1295_s1 + $0x8] sm:$0xf]  ;;  %v853_v44 = vld [vmem:[%s1295_s1 + $0x14] sm:$0xf0] }
  0x1f   : > { %336 = vmatpush.bf16.msra.mxu2 %v731_v16  ;;  %v743_v42 = vor.u32 %v855_v39, %v740_v40  ;;  %v851_v45 = vld [vmem:[%s1295_s1 + $0xc] sm:$0xf]  ;;  %v724_v46 = vld [vmem:[%s1295_s1 + $0x18] sm:$0xf0]  ;;  %v723_v47 = vor.u32 %v853_v44, %v722_v43  ;;  %v880_v52 = vld [vmem:[%s1296_s2 + $0x70] sm:$0xff]  ;;  %vm588_vm9 = vcmask 519168  }
  0x20   : > { %349 = vmatpush.bf16.msra.mxu3 %v735_v18  ;;  %v727_v48 = vor.u32 %v851_v45, %v724_v46  ;;  %v873_v49 = vld [vmem:[%s1296_s2 + $0x38] sm:$0xff]  ;;  %v871_v53 = vld [vmem:[%s1296_s2 + $0x28] sm:$0xff]  ;;  %v870_v55 = vld [vmem:[%s1296_s2 + $0x20] sm:$0xff]  ;;  %s960_s15 = sshra.s32 %s606_s6, 4  ;;  %s961_s15 = int_to_ptr.hbm [resolvable:$true] %s960_s15 }
  0x21   : > { %v881_v50 = vld [vmem:[%s1296_s2 + $0x78] sm:$0xff]  ;;  %555 = vmatpush.bf16.msra.mxu0 %v873_v49  ;;  %v879_v54 = vld [vmem:[%s1296_s2 + $0x68] sm:$0xff]  ;;  %v878_v56 = vld [vmem:[%s1296_s2 + $0x60] sm:$0xff]  ;;  %s962_s8 = scalar_lea.hbm %s961_s15, 4  ;;  %p967_p1 = scmp.lt.s32.totalorder %s961_s15, %s1297_s3 }
  0x22   : > { %568 = vmatpush.bf16.msra.mxu1 %v881_v50  ;;  %v869_v57 = vld [vmem:[%s1296_s2 + $0x18] sm:$0xff]  ;;  %v868_v59 = vld [vmem:[%s1296_s2 + $0x10] sm:$0xff]  ;;  %v867_v61 = vld [vmem:[%s1296_s2 + $0x8] sm:$0xff]  ;;  %p963_p12 = scmp.ne.s32.totalorder %s961_s15, %s962_s8  ;;  %p968_p2 = scmp.lt.s32.totalorder %s966_s11, %s962_s8 }
  0x23   : > { %337 = vmatpush.bf16.msra.mxu2 %v715_v26  ;;  %v877_v58 = vld [vmem:[%s1296_s2 + $0x58] sm:$0xff]  ;;  %v876_v60 = vld [vmem:[%s1296_s2 + $0x50] sm:$0xff]  ;;  %v875_v62 = vld [vmem:[%s1296_s2 + $0x48] sm:$0xff] }
  0x24   : > { %350 = vmatpush.bf16.msra.mxu3 %v719_v27  ;;  %v866_v63 = vld [vmem:[%s1296_s2] sm:$0xff]  ;;  %p964_p13 = pnand %p963_p12, %p1087_p4  ;;  %p969_p3 = por %p968_p2, %p967_p1 }
  0x25   : > { %556 = vmatpush.bf16.msra.mxu0 %v872_v51  ;;  %v874_v0 = vld [vmem:[%s1296_s2 + $0x40] sm:$0xff] }
  0x26   : > { %776 = vmatmul.msk.bf16.vlgmr.msra.gmra.mxu2 %vm227_vm0, %v229_v34  ;;  %569 = vmatpush.bf16.msra.mxu1 %v880_v52  ;;  %p965_p0 = pneg %p964_p13 }
  0x27   : > { %360 = vmatpush.bf16.msrb.mxu2 %v771_v28  ;;  %777 = vmatmul.msk.bf16.vlgmr.msra.gmra.mxu3 %vm227_vm0, %v229_v34 }
  0x28   : > { %373 = vmatpush.bf16.msrb.mxu3 %v775_v29  ;;  %p970_p5 = pnand %p969_p3, %p965_p0 }
  0x29   : > { %557 = vmatpush.bf16.msra.mxu0 %v871_v53 }
  0x2a   : > { %570 = vmatpush.bf16.msra.mxu1 %v879_v54 }
  0x2b   : > { %361 = vmatpush.bf16.msrb.mxu2 %v755_v35 }
  0x2c   : > { %374 = vmatpush.bf16.msrb.mxu3 %v759_v36 }
  0x2d   : > { %558 = vmatpush.bf16.msra.mxu0 %v870_v55 }
  0x2e   : > { %571 = vmatpush.bf16.msra.mxu1 %v878_v56 }
  0x2f   : > { %362 = vmatpush.bf16.msrb.mxu2 %v739_v41  ;;  %v1026_v41 = vmov 0.0  }
  0x30   : > { %375 = vmatpush.bf16.msrb.mxu3 %v743_v42  ;;  %228 = vst.msk [vmem:[#allocation2] sm:$0xff] %vm227_vm0, %v1026_v41 }
  0x31   : > { %559 = vmatpush.bf16.msra.mxu0 %v869_v57 }
  0x32   : > { %572 = vmatpush.bf16.msra.mxu1 %v877_v58 }
  0x33   : > { %363 = vmatpush.bf16.msrb.mxu2 %v723_v47 }
  0x34   : > { %376 = vmatpush.bf16.msrb.mxu3 %v727_v48 }
  0x35   : > { %560 = vmatpush.bf16.msra.mxu0 %v868_v59 }
  0x36   : > { %778 = vmatmul.msk.bf16.vlgmr.msrb.gmra.mxu2 %vm227_vm0, %v229_v34  ;;  %573 = vmatpush.bf16.msra.mxu1 %v876_v60 }
  0x37   : > { %779 = vmatmul.msk.bf16.vlgmr.msrb.gmra.mxu3 %vm227_vm0, %v229_v34  ;;  %v424_v43 = vld [vmem:[#allocation2] sm:$0xff] }
  0x39   : > { %561 = vmatpush.bf16.msra.mxu0 %v867_v61 }
  0x3a   : > { %574 = vmatpush.bf16.msra.mxu1 %v875_v62 }
  0x3d   : > { %562 = vmatpush.bf16.msra.mxu0 %v866_v63 }
  0x3e   : > { %575 = vmatpush.bf16.msra.mxu1 %v874_v0 }
  0xa9   : > { %v339_v1 = vpop.f32.mrf.mxu2 }
  0xaa   : > { %v780_v2 = vmul.f32 -1.442695, %v339_v1  ;;  %v352_v3 = vpop.f32.mrf.mxu3 }
  0xab   : > { %v781_v4 = vmul.f32 -1.442695, %v352_v3 }
  0xac   : > { %938 = vpow2.f32 %v780_v2 }
  0xad   : > { %940 = vpow2.f32 %v781_v4 }
  0xb1   : > { %v341_v5 = vpop.f32.mrf.mxu2 }
  0xb2   : > { %v939_v6 = vpop.eup %938  ;;  %v354_v7 = vpop.f32.mrf.mxu3 }
  0xb3   : > { %v941_v8 = vpop.eup %940  ;;  %v388_v9 = vadd.f32 1.0, %v939_v6 }
  0xb4   : > { %v389_v10 = vadd.f32 1.0, %v941_v8 }
  0xb5   : > { %942 = vrcp.f32 %v388_v9  ;;  %v401_v18 = vand.u32 2147483648, %v388_v9  ;;  %v399_v21 = vand.u32 2147483647, %v388_v9  ;;  %vm395_vm3 = vweird.f32 %v388_v9 }
  0xb6   : > { %944 = vrcp.f32 %v389_v10  ;;  %v416_v22 = vand.u32 2147483648, %v389_v10  ;;  %v414_v24 = vand.u32 2147483647, %v389_v10  ;;  %vm410_vm5 = vweird.f32 %v389_v10 }
  0xb7   : > { %v402_v28 = vor.u32 1.1754944e-38, %v401_v18  ;;  %vm400_vm6 = vcmp.eq.f32.partialorder %v399_v21, 8.507059e+37 }
  0xb8   : > { %v417_v31 = vor.u32 1.1754944e-38, %v416_v22  ;;  %vm415_vm8 = vcmp.eq.f32.partialorder %v414_v24, 8.507059e+37 }
  0xb9   : > { %v365_v11 = vpop.f32.mrf.mxu2 }
  0xba   : > { %v378_v12 = vpop.f32.mrf.mxu3 }
  0xbb   : > { %v943_v13 = vpop.eup %942 }
  0xbc   : > { %v945_v14 = vpop.eup %944  ;;  %v391_v15 = vmul.f32 %v943_v13, %v388_v9  ;;  %vm396_vm1 = vweird.f32 %v943_v13 }
  0xbd   : > { %v406_v16 = vmul.f32 %v945_v14, %v389_v10  ;;  %vm411_vm2 = vweird.f32 %v945_v14  ;;  %vm397_vm4 = vmor %vm395_vm3, %vm396_vm1 }
  0xbe   : > { %v392_v17 = vsub.f32 1.0, %v391_v15  ;;  %vm412_vm7 = vmor %vm410_vm5, %vm411_vm2 }
  0xbf   : > { %v407_v19 = vsub.f32 1.0, %v406_v16 }
  0xc0   : > { %v393_v20 = vmul.f32 %v943_v13, %v392_v17 }
  0xc1   : > { %v408_v23 = vmul.f32 %v945_v14, %v407_v19  ;;  %v367_v25 = vpop.f32.mrf.mxu2 }
  0xc2   : > { %v394_v26 = vadd.f32 %v943_v13, %v393_v20  ;;  %v380_v27 = vpop.f32.mrf.mxu3 }
  0xc3   : > { %v409_v29 = vadd.f32 %v945_v14, %v408_v23 }
  0xc4   : > { %v398_v30 = vsel %vm397_vm4, %v943_v13, %v394_v26 }
  0xc5   : > { %v403_v32 = vsel %vm400_vm6, %v402_v28, %v398_v30  ;;  %v413_v33 = vsel %vm412_vm7, %v945_v14, %v409_v29 }
  0xc6   : > { %v420_v34 = vmul.f32 %v403_v32, %v339_v1  ;;  %v418_v35 = vsel %vm415_vm8, %v417_v31, %v413_v33 }
  0xc7   : > { %v421_v36 = vmul.f32 %v418_v35, %v352_v3 }
  0xc8   : > { %v422_v37 = vmul.f32 %v420_v34, %v365_v11 }
  0xc9   : > { %v423_v38 = vmul.f32 %v421_v36, %v378_v12 }
  0xca   : > { %v425_v39 = vpack.c.bf16 %v422_v37, %v422_v37 }
  0xcb   : > { %v426_v40 = vpack.c.bf16 %v423_v38, %v423_v38 }
  0xcc   : > { %563 = vmatmul.bf16.vlgmr.msra.gmra.mxu0 %v425_v39 }
  0xcd   : > { %576 = vmatmul.bf16.vlgmr.msra.gmra.mxu1 %v426_v40 }
 0x149   : > { %v564_v42 = vpop.f32.mrf.mxu0 }
 0x14a   : > { %v577_v44 = vpop.f32.mrf.mxu1 }
 0x14b   : > { %v578_v45 = vadd.f32 %v577_v44, %v564_v42 }
 0x14d   : > { %v581_v46 = vadd.f32 %v578_v45, %v424_v43 }
 0x14f   : > { %582 = vst.msk [vmem:[#allocation2] sm:$0xff] %vm227_vm0, %v581_v46 }
 0x151   : > { %v566_v47 = vpop.f32.mrf.mxu0 }
 0x152   : > { %v579_v48 = vpop.f32.mrf.mxu1 }
 0x156   : > { %v586_v49 = vld [vmem:[#allocation2] sm:$0xff] }
 0x157   : > { %v587_v50 = vpack.c.bf16 %v586_v49, %v586_v49 }
 0x159   : > { %589 = vst.msk [vmem:[%s205_s4] sm:$0xf] %vm588_vm9, %v587_v50 }
 0x15a   : > { %973 = shalt.err (!%p970_p5)
}
 0x15b   : > { %882 = dma.vmem_to_hbm [thread:$0]  (%p1087_p4), %s604_s5, 64, %s606_s6, %s591_s7  }
 0x15c PF: > { %p888_p6 = scmp.ge.s32.totalorder %s1024_s17, 2  ;;  %s617_s21 = sand.u32 1, %s1004_s12  }
 0x15d   : > { %s618_s26 = scalar_lea.sflag [#allocation4], %s617_s21 }
 0x15e   : > { %p885_p7 = pnand %p888_p6, %p1094_p8 }
 0x160   : > { %p886_p9 = pneg %p885_p7 }
 0x162   : > { %999 = dma.done.wait (%p886_p9), %s618_s26, 64  }
 0x163   : > { %1001 = vsyncadd (%p886_p9), %s618_s26, 4294967232  ;;  %s16_s17 = sadd.s32 1, %s1024_s17   ;;  %s1300_s12 = smov %s1008_s13 }
 0x164   : > { %p13_p10 = scmp.ge.s32.totalorder %s16_s17, 4   ;;  %s1301_s13 = smov %s1012_s14 }
 0x165   : > { %s1302_s14 = smov %s1100_s25  ;;  %s1303_s15 = smov %s1020_s16 }
 0x166   : > { %s1304_s16 = smov %s1306_s20  ;;  %15 = sbr.rel (!%p13_p10) target bundleno = 4 (0x4), region = 81 }
 0x16b   :  { %624 = vsyncpa [#allocation4], 1 }
 0x16c   :  { %626 = vsyncpa [#allocation4 + $0x1], 1 }

</bundles_post_ra>
